<compile_context>
chip_gen: v7x
topology: tpu7x:2x2x1
jax: 0.10.0
libtpu: 0.0.40
codegen_flags: <defaults>
</compile_context>

<pallas_src>
import functools
import math

import numpy as np
import jax
import jax.numpy as jnp
from jax import lax
from jax.experimental import pallas as pl
from jax.experimental.pallas import tpu as pltpu

# ----------------------------- "cfg" constants --------------------------------
NUM_JOINTS = 17          # cfg.MODEL.NUM_JOINTS  (not used in forward)
NUM_CLASSES = 5          # cfg.DATASET.NUM_CLASSES
LAYERS = 2               # cfg.SEARCH.LAYERS
INIT_CHANNELS = 8        # cfg.SEARCH.INIT_CHANNELS
STEPS = 4
MULTIPLIER = 4
BN_EPS = 1e-5
PSP_OUT = 512
PSP_SIZES = (1, 2, 3, 6)

PRIMITIVES = [
    'none', 'max_pool_3x3', 'avg_pool_3x3', 'skip_connect',
    'sep_conv_3x3', 'sep_conv_5x5', 'dil_conv_3x3', 'dil_conv_5x5',
]

VMEM = pltpu.MemorySpace.VMEM
SMEM = pltpu.MemorySpace.SMEM


def _round_up(x, m):
    return (x + m - 1) // m * m


# ============================ Pallas kernels ===================================

def _matmul_kernel(a_ref, b_ref, o_ref, acc_ref):
    @pl.when(pl.program_id(2) == 0)
    def _():
        acc_ref[...] = jnp.zeros_like(acc_ref)
    acc_ref[...] += jnp.dot(a_ref[...], b_ref[...],
                            preferred_element_type=jnp.float32)
    @pl.when(pl.program_id(2) == pl.num_programs(2) - 1)
    def _():
        o_ref[...] = acc_ref[...].astype(o_ref.dtype)


def matmul_pallas(a, b):
    """a: (M, K), b: (K, N) -> (M, N) f32.  bf16 MXU matmul, f32 accumulation.

    Tile selection follows the perf review: right-sized tm, single k-step for
    small K, tk=2048 for very deep K (head bottleneck), tn=256 for N>=256
    (feeds the 256-wide MXU on v6e/v7x), pads skipped when already aligned.
    """
    M, K = a.shape
    K2, N = b.shape
    assert K == K2
    a = a.astype(jnp.bfloat16)
    b = b.astype(jnp.bfloat16)

    Kp = _round_up(K, 128)
    if Kp <= 2048:
        tk = Kp                      # single k step for all the small convs
    else:
        tk = 2048                    # head bottleneck: K=19008 -> 10 k steps
        Kp = _round_up(K, tk)
    Np = _round_up(N, 128)
    tn = 256 if Np % 256 == 0 else 128
    Mp = _round_up(M, 16)            # bf16 sublane packing
    tm = min(Mp, 512)
    Mp = _round_up(Mp, tm)

    if (Mp, Kp) != (M, K):
        a = jnp.pad(a, ((0, Mp - M), (0, Kp - K)))
    if (Kp, Np) != (K, N):
        b = jnp.pad(b, ((0, Kp - K), (0, Np - N)))

    out = pl.pallas_call(
        _matmul_kernel,
        out_shape=jax.ShapeDtypeStruct((Mp, Np), jnp.float32),
        grid=(Mp // tm, Np // tn, Kp // tk),
        in_specs=[pl.BlockSpec((tm, tk), lambda i, j, k: (i, k)),
                  pl.BlockSpec((tk, tn), lambda i, j, k: (k, j))],
        out_specs=pl.BlockSpec((tm, tn), lambda i, j, k: (i, j)),
        scratch_shapes=[pltpu.VMEM((tm, tn), jnp.float32)],
        compiler_params=pltpu.CompilerParams(
            dimension_semantics=("parallel", "parallel", "arbitrary")),
    )(a, b)
    if (Mp, Np) != (M, N):
        out = out[:M, :N]
    return out


def _bn_kernel(x_ref, g_ref, b_ref, o_ref, *, relu, inv_count):
    """Fused train-mode BatchNorm: stats + normalize + affine + optional ReLU."""
    x = x_ref[...]
    mean = jnp.sum(x, axis=0, keepdims=True) * inv_count
    xc = x - mean
    var = jnp.sum(xc * xc, axis=0, keepdims=True) * inv_count
    scale = lax.rsqrt(var + BN_EPS) * g_ref[...]
    y = xc * scale + b_ref[...]
    if relu:
        y = jnp.maximum(y, 0.0)
    o_ref[...] = y


def batch_norm(x, gamma=None, beta=None, relu=False):
    """Training-mode BatchNorm2d (batch statistics, biased variance), one pass."""
    N, H, W, C = x.shape
    M = N * H * W
    x2 = x.reshape(M, C)
    g = (gamma if gamma is not None else jnp.ones((C,), jnp.float32)).reshape(1, C)
    b = (beta if beta is not None else jnp.zeros((C,), jnp.float32)).reshape(1, C)
    y = pl.pallas_call(
        functools.partial(_bn_kernel, relu=relu, inv_count=1.0 / M),
        out_shape=jax.ShapeDtypeStruct((M, C), jnp.float32),
        in_specs=[pl.BlockSpec(memory_space=VMEM)] * 3,
        out_specs=pl.BlockSpec(memory_space=VMEM),
    )(x2, g, b)
    return y.reshape(N, H, W, C)


def _relu_kernel(x_ref, o_ref):
    o_ref[...] = jnp.maximum(x_ref[...], 0.0)


def relu_pallas(x):
    return pl.pallas_call(
        _relu_kernel,
        out_shape=jax.ShapeDtypeStruct(x.shape, jnp.float32),
        in_specs=[pl.BlockSpec(memory_space=VMEM)],
        out_specs=pl.BlockSpec(memory_space=VMEM),
    )(x)


def _bias_kernel(x_ref, b_ref, o_ref):
    o_ref[...] = x_ref[...] + b_ref[...]


def bias_add(x, bias):
    N, H, W, C = x.shape
    return pl.pallas_call(
        _bias_kernel,
        out_shape=jax.ShapeDtypeStruct(x.shape, jnp.float32),
        in_specs=[pl.BlockSpec(memory_space=VMEM)] * 2,
        out_specs=pl.BlockSpec(memory_space=VMEM),
    )(x, bias.reshape(1, 1, 1, C))


def _dwconv_kernel(x_ref, w_ref, o_ref, *, kh, kw, dilation):
    """Direct VPU depthwise conv: kh*kw shifted multiply-adds over the NHWC tile."""
    nb, ho, wo, c = o_ref.shape
    acc = None
    for i in range(kh):
        for j in range(kw):
            patch = x_ref[:, pl.ds(i * dilation, ho), pl.ds(j * dilation, wo), :]
            term = patch * w_ref[i * kw + j, :]
            acc = term if acc is None else acc + term
    o_ref[...] = acc


def depthwise_conv2d(x, dw, stride=1, padding=0, dilation=1):
    """x: (N,H,W,C) NHWC, dw: (kh,kw,C) -> (N,Ho,Wo,C).  No im2col expansion."""
    N, H, W, C = x.shape
    kh, kw, _ = dw.shape
    xp = (jnp.pad(x, ((0, 0), (padding, padding), (padding, padding), (0, 0)))
          if padding else x)
    Hf = H + 2 * padding - dilation * (kh - 1)
    Wf = W + 2 * padding - dilation * (kw - 1)
    out = pl.pallas_call(
        functools.partial(_dwconv_kernel, kh=kh, kw=kw, dilation=dilation),
        out_shape=jax.ShapeDtypeStruct((N, Hf, Wf, C), jnp.float32),
        in_specs=[pl.BlockSpec(memory_space=VMEM),
                  pl.BlockSpec(memory_space=VMEM)],
        out_specs=pl.BlockSpec(memory_space=VMEM),
    )(xp, dw.reshape(kh * kw, C))
    if stride > 1:
        # stride handled by subsampling the stride-1 result (waste negligible
        # at these tiny spatial sizes, avoids strided in-kernel loads).
        out = out[:, ::stride, ::stride, :]
    return out


def _wsum_kernel(*refs):
    w_ref = refs[0]
    x_refs = refs[1:-1]
    o_ref = refs[-1]
    acc = x_refs[0][...] * w_ref[0]
    for p in range(1, len(x_refs)):
        acc = acc + x_refs[p][...] * w_ref[p]
    o_ref[...] = acc


def weighted_sum_pallas(xs, w):
    """MixedOp reduction: sum_p w[p] * xs[p], alphas in SMEM, no stack copy."""
    P = len(xs)
    return pl.pallas_call(
        _wsum_kernel,
        out_shape=jax.ShapeDtypeStruct(xs[0].shape, jnp.float32),
        in_specs=[pl.BlockSpec(memory_space=SMEM)]
                 + [pl.BlockSpec(memory_space=VMEM)] * P,
        out_specs=pl.BlockSpec(memory_space=VMEM),
    )(w.astype(jnp.float32), *xs)


# ======================== conv / pooling helpers ===============================

def im2col(x, kh, kw, stride, padding, dilation):
    N, H, W, C = x.shape
    xp = jnp.pad(x, ((0, 0), (padding, padding), (padding, padding), (0, 0)))
    Ho = (H + 2 * padding - dilation * (kh - 1) - 1) // stride + 1
    Wo = (W + 2 * padding - dilation * (kw - 1) - 1) // stride + 1
    cols = []
    for i in range(kh):
        for j in range(kw):
            h0, w0 = i * dilation, j * dilation
            cols.append(xp[:, h0:h0 + stride * (Ho - 1) + 1:stride,
                           w0:w0 + stride * (Wo - 1) + 1:stride, :])
    return jnp.concatenate(cols, axis=-1), Ho, Wo   # (N, Ho, Wo, kh*kw*C)


def conv2d(x, w, stride=1, padding=0, dilation=1):
    """x: (N,H,W,Cin) NHWC, w: (kh,kw,Cin,Cout) -> (N,Ho,Wo,Cout) via MXU matmul."""
    kh, kw, cin, cout = w.shape
    N = x.shape[0]
    if kh == 1 and kw == 1 and padding == 0 and dilation == 1:
        xs = x if stride == 1 else x[:, ::stride, ::stride, :]
        Ho, Wo = xs.shape[1], xs.shape[2]
        a = xs.reshape(N * Ho * Wo, cin)
    else:
        cols, Ho, Wo = im2col(x, kh, kw, stride, padding, dilation)
        a = cols.reshape(N * Ho * Wo, kh * kw * cin)
    y = matmul_pallas(a, w.reshape(kh * kw * cin, cout))
    return y.reshape(N, Ho, Wo, cout)


# TODO(synk): pooling / adaptive-pool / bilinear-resize below are thin JAX glue
# (lax.reduce_window + tiny interpolation einsums), not hand-written Pallas.
def max_pool_3x3(x, stride):
    return lax.reduce_window(x, -jnp.inf, lax.max, (1, 3, 3, 1),
                             (1, stride, stride, 1),
                             [(0, 0), (1, 1), (1, 1), (0, 0)])


def avg_pool_3x3(x, stride):
    pad = [(0, 0), (1, 1), (1, 1), (0, 0)]
    s = lax.reduce_window(x, 0.0, lax.add, (1, 3, 3, 1),
                          (1, stride, stride, 1), pad)
    cnt = lax.reduce_window(jnp.ones_like(x), 0.0, lax.add, (1, 3, 3, 1),
                            (1, stride, stride, 1), pad)
    return s / cnt       # count_include_pad=False (DARTS convention)


def adaptive_avg_pool(x, out_h, out_w):
    N, H, W, C = x.shape
    def pool_mat(inp, out):
        m = np.zeros((out, inp), np.float32)
        for o in range(out):
            s = (o * inp) // out
            e = -((-(o + 1) * inp) // out)
            m[o, s:e] = 1.0 / (e - s)
        return jnp.asarray(m)
    y = jnp.einsum('oh,nhwc->nowc', pool_mat(H, out_h), x)
    y = jnp.einsum('pw,nowc->nopc', pool_mat(W, out_w), y)
    return y


def upsample_bilinear(x, out_h, out_w):
    """F.upsample(..., mode='bilinear', align_corners=True)."""
    N, H, W, C = x.shape
    def interp_mat(inp, out):
        m = np.zeros((out, inp), np.float32)
        if out == 1 or inp == 1:
            m[:, 0] = 1.0
            return jnp.asarray(m)
        for o in range(out):
            src = o * (inp - 1) / (out - 1)
            lo = int(np.floor(src))
            hi = min(lo + 1, inp - 1)
            f = src - lo
            m[o, lo] += 1.0 - f
            m[o, hi] += f
        return jnp.asarray(m)
    y = jnp.einsum('oh,nhwc->nowc', interp_mat(H, out_h), x)
    y = jnp.einsum('pw,nowc->nopc', interp_mat(W, out_w), y)
    return y


# ============================ DARTS primitive ops ==============================

def std_conv_fwd(p, x, stride, padding):          # ReLU -> Conv -> BN(affine=False)
    y = relu_pallas(x)
    y = conv2d(y, p['w'], stride=stride, padding=padding)
    return batch_norm(y)


def factorized_reduce_fwd(p, x_relu):             # input is already ReLU'd
    y1 = conv2d(x_relu, p['c1'], stride=2, padding=0)
    y2 = conv2d(x_relu[:, 1:, 1:, :], p['c2'], stride=2, padding=0)
    return batch_norm(jnp.concatenate([y1, y2], axis=-1))


def sep_conv_fwd(p, x_relu, k, stride):           # input is already ReLU'd
    pad = (k - 1) // 2
    y = depthwise_conv2d(x_relu, p['dw1'], stride=stride, padding=pad)
    y = conv2d(y, p['pw1'])
    y = batch_norm(y, relu=True)   # fused BN + the ReLU opening the 2nd block
    y = depthwise_conv2d(y, p['dw2'], stride=1, padding=pad)
    y = conv2d(y, p['pw2'])
    return batch_norm(y)


def dil_conv_fwd(p, x_relu, k, stride, dilation):  # input is already ReLU'd
    pad = dilation * (k - 1) // 2
    y = depthwise_conv2d(x_relu, p['dw'], stride=stride, padding=pad,
                         dilation=dilation)
    y = conv2d(y, p['pw'])
    return batch_norm(y)


def mixed_op_forward(op, x, w_row):
    stride = op['stride']
    x_relu = relu_pallas(x)   # shared ReLU for all conv-style primitives
    # TODO(synk): the four primitives' 1x1 pointwise convs could be batched into
    # one lane-dense matmul (concat along N) to better feed v7x's two TensorCores.
    outs = []
    for prim in PRIMITIVES:
        if prim == 'none':
            continue   # exact-zero contribution, dropped from the weighted sum
        p = op['params'][prim]
        if prim == 'max_pool_3x3':
            y = batch_norm(max_pool_3x3(x, stride))    # MixedOp BN wrapper on pools
        elif prim == 'avg_pool_3x3':
            y = batch_norm(avg_pool_3x3(x, stride))
        elif prim == 'skip_connect':
            y = x if stride == 1 else factorized_reduce_fwd(p, x_relu)
        elif prim == 'sep_conv_3x3':
            y = sep_conv_fwd(p, x_relu, 3, stride)
        elif prim == 'sep_conv_5x5':
            y = sep_conv_fwd(p, x_relu, 5, stride)
        elif prim == 'dil_conv_3x3':
            y = dil_conv_fwd(p, x_relu, 3, stride, 2)
        elif prim == 'dil_conv_5x5':
            y = dil_conv_fwd(p, x_relu, 5, stride, 2)
        outs.append(y)
    return weighted_sum_pallas(outs, w_row[1:])    # w_row[0] is 'none'


def cell_forward(cell, s0, s1, weights):
    if cell['reduction_prev']:
        s0 = factorized_reduce_fwd(cell['pre0'], relu_pallas(s0))
    else:
        s0 = std_conv_fwd(cell['pre0'], s0, stride=1, padding=0)
    s1 = std_conv_fwd(cell['pre1'], s1, stride=1, padding=0)
    states = [s0, s1]
    offset = 0
    for _ in range(STEPS):
        s = None
        for j, h in enumerate(states):
            o = mixed_op_forward(cell['ops'][offset + j], h, weights[offset + j])
            s = o if s is None else s + o
        offset += len(states)
        states.append(s)
    return jnp.concatenate(states[-MULTIPLIER:], axis=-1)


def head_forward(hp, feats):
    N, H, W, C = feats.shape
    priors = []
    for sp, size in zip(hp['stages'], PSP_SIZES):
        y = adaptive_avg_pool(feats, size, size)
        y = conv2d(y, sp['w'])
        y = batch_norm(y, sp['g'], sp['b'])
        priors.append(upsample_bilinear(y, H, W))
    priors.append(feats)
    cat = jnp.concatenate(priors, axis=-1)
    y = conv2d(cat, hp['bott_w'], stride=1, padding=1)
    y = batch_norm(y, hp['bott_g'], hp['bott_b'], relu=True)
    # TODO(synk): Dropout2d(0.1) is stochastic; applied as identity here.
    y = conv2d(y, hp['final_w'])
    return bias_add(y, hp['final_b'])


# ============================ parameter builders ===============================

class ParamGen:
    def __init__(self, seed=0):
        self.key = jax.random.PRNGKey(seed)
        self.count = 0

    def _next(self):
        self.count += 1
        return jax.random.fold_in(self.key, self.count)

    def conv(self, kh, kw, cin, cout):
        std = math.sqrt(2.0 / (kh * kw * cin))
        return std * jax.random.normal(self._next(), (kh, kw, cin, cout), jnp.float32)

    def dwconv(self, kh, kw, c):
        std = math.sqrt(2.0 / (kh * kw))
        return std * jax.random.normal(self._next(), (kh, kw, c), jnp.float32)

    def vec(self, n, std=0.01):
        return std * jax.random.normal(self._next(), (n,), jnp.float32)


def make_sep(pg, C, k):
    return {'dw1': pg.dwconv(k, k, C), 'pw1': pg.conv(1, 1, C, C),
            'dw2': pg.dwconv(k, k, C), 'pw2': pg.conv(1, 1, C, C)}


def make_dil(pg, C, k):
    return {'dw': pg.dwconv(k, k, C), 'pw': pg.conv(1, 1, C, C)}


def make_fact_reduce(pg, cin, cout):
    return {'c1': pg.conv(1, 1, cin, cout // 2), 'c2': pg.conv(1, 1, cin, cout // 2)}


def make_mixed_op(pg, C, stride):
    params = {}
    for prim in PRIMITIVES:
        if prim in ('none', 'max_pool_3x3', 'avg_pool_3x3'):
            params[prim] = None
        elif prim == 'skip_connect':
            params[prim] = None if stride == 1 else make_fact_reduce(pg, C, C)
        elif prim == 'sep_conv_3x3':
            params[prim] = make_sep(pg, C, 3)
        elif prim == 'sep_conv_5x5':
            params[prim] = make_sep(pg, C, 5)
        elif prim == 'dil_conv_3x3':
            params[prim] = make_dil(pg, C, 3)
        elif prim == 'dil_conv_5x5':
            params[prim] = make_dil(pg, C, 5)
    return {'params': params, 'stride': stride}


def build_cell(pg, C_pp, C_p, C, reduction, reduction_prev):
    cell = {'reduction': reduction, 'reduction_prev': reduction_prev}
    if reduction_prev:
        cell['pre0'] = make_fact_reduce(pg, C_pp, C)
    else:
        cell['pre0'] = {'w': pg.conv(1, 1, C_pp, C)}
    cell['pre1'] = {'w': pg.conv(1, 1, C_p, C)}
    ops = []
    for i in range(STEPS):
        for j in range(2 + i):
            stride = 2 if reduction and j < 2 else 1
            ops.append(make_mixed_op(pg, C, stride))
    cell['ops'] = ops
    return cell


def build_network(pg):
    C = INIT_CHANNELS
    net = {
        'stem0': {'w': pg.conv(3, 3, 3, C), 'g': jnp.ones(C), 'b': jnp.zeros(C)},
        'stem1': {'w': pg.conv(3, 3, C, 2 * C), 'g': jnp.ones(2 * C), 'b': jnp.zeros(2 * C)},
        'stem2': {'w': pg.conv(3, 3, 2 * C, 2 * C), 'g': jnp.ones(2 * C), 'b': jnp.zeros(2 * C)},
    }
    C_pp, C_p, C_curr = 2 * C, 2 * C, C // 2
    cells, red_prev = [], False
    for i in range(LAYERS):
        if i in [LAYERS // 4, 2 * LAYERS // 4, 3 * LAYERS // 4]:
            C_curr *= 2
            reduction = True
        else:
            reduction = False
        cells.append(build_cell(pg, C_pp, C_p, C_curr, reduction, red_prev))
        red_prev = reduction
        C_pp, C_p = C_p, MULTIPLIER * C_curr
    net['cells'] = cells
    inplanes = C_p
    stages = [{'w': pg.conv(1, 1, inplanes, PSP_OUT),
               'g': jnp.ones(PSP_OUT), 'b': jnp.zeros(PSP_OUT)} for _ in PSP_SIZES]
    net['head'] = {
        'stages': stages,
        'bott_w': pg.conv(3, 3, inplanes + len(PSP_SIZES) * PSP_OUT, PSP_OUT),
        'bott_g': jnp.ones(PSP_OUT), 'bott_b': jnp.zeros(PSP_OUT),
        'final_w': pg.conv(1, 1, PSP_OUT, NUM_CLASSES),
        'final_b': pg.vec(NUM_CLASSES),
    }
    k = sum(1 for i in range(STEPS) for _ in range(2 + i))
    net['alphas_normal'] = 0.1 * jnp.ones((k, len(PRIMITIVES)), jnp.float32)
    net['alphas_reduce'] = 0.1 * jnp.ones((k, len(PRIMITIVES)), jnp.float32)
    return net


# =============================== forward pass ==================================

def stem_fwd(p, x, stride, relu):
    y = conv2d(x, p['w'], stride=stride, padding=1)
    return batch_norm(y, p['g'], p['b'], relu=relu)


def network_forward(net, x_nchw):
    x = jnp.transpose(x_nchw, (0, 2, 3, 1)).astype(jnp.float32)   # NCHW -> NHWC
    s0 = stem_fwd(net['stem0'], x, stride=2, relu=True)
    s0 = stem_fwd(net['stem1'], s0, stride=2, relu=True)
    s1 = stem_fwd(net['stem2'], s0, stride=1, relu=False)
    w_norm = jax.nn.softmax(net['alphas_normal'], axis=-1)
    w_red = jax.nn.softmax(net['alphas_reduce'], axis=-1)
    for cell in net['cells']:
        weights = w_red if cell['reduction'] else w_norm
        s0, s1 = s1, cell_forward(cell, s0, s1, weights)
    logits = head_forward(net['head'], s1)
    return jnp.transpose(logits, (0, 3, 1, 2))                     # NHWC -> NCHW


# ==================================== main =====================================

if __name__ == "__main__":
    key = jax.random.PRNGKey(0)
    x = jax.random.normal(key, (2, 3, 64, 64), jnp.float32)   # NCHW, like PyTorch
    net = build_network(ParamGen(seed=0))
    out = network_forward(net, x)
    out = jax.block_until_ready(out)
    assert out.shape == (2, NUM_CLASSES, 4, 4), out.shape
    assert bool(jnp.all(jnp.isfinite(out)))
    print("KERNEL_OK")
</pallas_src>

<mosaic_0001>
module attributes {stable_mosaic.version = 11 : i64} {
  func.func @_matmul_kernel(%arg0: i32, %arg1: i32, %arg2: i32, %arg3: memref<512x128xbf16, #tpu.memory_space<vmem>>, %arg4: memref<128x128xbf16, #tpu.memory_space<vmem>>, %arg5: memref<512x128xf32, #tpu.memory_space<vmem>>, %arg6: memref<512x128xf32, #tpu.memory_space<vmem>>) attributes {dimension_semantics = [#tpu.dimension_semantics<parallel>, #tpu.dimension_semantics<parallel>, #tpu.dimension_semantics<arbitrary>], iteration_bounds = array<i64: 4, 1, 1>, scalar_prefetch = 0 : i64, scratch_operands = 1 : i64, tpu.core_type = #tpu.core_type<tc>, window_params = [{transform_indices = @transform_0, window_bounds = array<i64: 512, 128>}, {transform_indices = @transform_1, window_bounds = array<i64: 128, 128>}, {transform_indices = @transform_2, window_bounds = array<i64: 512, 128>}]} {
    %c0_i32 = arith.constant 0 : i32
    %0 = arith.cmpi eq, %arg2, %c0_i32 : i32
    %1 = arith.extui %0 : i1 to i32
    %c0_i32_0 = arith.constant 0 : i32
    %2 = arith.cmpi ne, %1, %c0_i32_0 : i32
    scf.if %2 {
      %cst_10 = arith.constant 0.000000e+00 : f32
      %12 = vector.broadcast %cst_10 : f32 to vector<512x128xf32>
      %c0_11 = arith.constant 0 : index
      %c0_12 = arith.constant 0 : index
      %13 = vector.load %arg6[%c0_11, %c0_12] : memref<512x128xf32, #tpu.memory_space<vmem>>, vector<512x128xf32>
      tpu.vector_store %arg6[%c0_11, %c0_12], %12 {strides = array<i32>} : memref<512x128xf32, #tpu.memory_space<vmem>>, vector<512x128xf32>,
    } else {
    }
    %c0 = arith.constant 0 : index
    %c0_1 = arith.constant 0 : index
    %3 = vector.load %arg6[%c0, %c0_1] : memref<512x128xf32, #tpu.memory_space<vmem>>, vector<512x128xf32>
    %c0_2 = arith.constant 0 : index
    %c0_3 = arith.constant 0 : index
    %4 = vector.load %arg3[%c0_2, %c0_3] : memref<512x128xbf16, #tpu.memory_space<vmem>>, vector<512x128xbf16>
    %c0_4 = arith.constant 0 : index
    %c0_5 = arith.constant 0 : index
    %5 = vector.load %arg4[%c0_4, %c0_5] : memref<128x128xbf16, #tpu.memory_space<vmem>>, vector<128x128xbf16>
    %cst = arith.constant dense<0.000000e+00> : vector<512x128xf32>
    %6 = tpu.matmul %4, %5, %cst {dimension_numbers = #tpu.dot_dimension_numbers<[1], [0], [0], [1], [0, 0, 1, 1], [], []>} : vector<512x128xbf16>, vector<128x128xbf16>, vector<512x128xf32> -> vector<512x128xf32>
    %7 = arith.addf %3, %6 : vector<512x128xf32>
    %c0_6 = arith.constant 0 : index
    %c0_7 = arith.constant 0 : index
    %8 = vector.load %arg6[%c0_6, %c0_7] : memref<512x128xf32, #tpu.memory_space<vmem>>, vector<512x128xf32>
    tpu.vector_store %arg6[%c0_6, %c0_7], %7 {strides = array<i32>} : memref<512x128xf32, #tpu.memory_space<vmem>>, vector<512x128xf32>,
    %c0_i32_8 = arith.constant 0 : i32
    %9 = arith.cmpi eq, %arg2, %c0_i32_8 : i32
    %10 = arith.extui %9 : i1 to i32
    %c0_i32_9 = arith.constant 0 : i32
    %11 = arith.cmpi ne, %10, %c0_i32_9 : i32
    scf.if %11 {
      %c0_10 = arith.constant 0 : index
      %c0_11 = arith.constant 0 : index
      %12 = vector.load %arg6[%c0_10, %c0_11] : memref<512x128xf32, #tpu.memory_space<vmem>>, vector<512x128xf32>
      %c0_12 = arith.constant 0 : index
      %c0_13 = arith.constant 0 : index
      %13 = vector.load %arg5[%c0_12, %c0_13] : memref<512x128xf32, #tpu.memory_space<vmem>>, vector<512x128xf32>
      tpu.vector_store %arg5[%c0_12, %c0_13], %12 {strides = array<i32>} : memref<512x128xf32, #tpu.memory_space<vmem>>, vector<512x128xf32>,
    } else {
    }
    return
  }
  func.func @transform_0(%arg0: i32, %arg1: i32, %arg2: i32) -> (i32, i32) {
    %c0_i32 = arith.constant 0 : i32
    return %arg0, %arg2 : i32, i32
  }
  func.func @transform_1(%arg0: i32, %arg1: i32, %arg2: i32) -> (i32, i32) {
    %c0_i32 = arith.constant 0 : i32
    return %arg2, %arg1 : i32, i32
  }
  func.func @transform_2(%arg0: i32, %arg1: i32, %arg2: i32) -> (i32, i32) {
    %c0_i32 = arith.constant 0 : i32
    return %arg0, %arg1 : i32, i32
  }
}

</mosaic_0001>

<bundles_post_ra>
// kernel: tpu_custom_call.1
= control target key start
LH: loop header
LB: loop body
LE: loop exit
PB: predicated region body
PF: predicated region fallthrough
CT: control target
= control target key end

     0   :  { %7 = vsyncpa [#allocation4], 0  ;;  %s2138_s0 = inlined_call_operand.hbm [shape: bf16[2048,128], index: 0, kind: input, shape index: {}]   ;;  %s2139_s1 = inlined_call_operand.hbm [shape: bf16[128,128], index: 1, kind: input, shape index: {}]   ;;  %s2140_s2 = inlined_call_operand.hbm [shape: f32[2048,128], index: 2, kind: output, shape index: {}]  }
   0x1   :  { %9 = vsyncpa [#allocation4 + $0x1], 0 }
   0x2   :  { %10 = vsyncpa [#allocation7], 0 }
   0x3   :  { %11 = vsyncpa [#allocation5], 0 }
   0x4   :  { %13 = vsyncpa [#allocation5 + $0x1], 0  ;;  %s1813_s9 = smov 0   ;;  %s1815_s10 = smov 0  }
   0x5   :  { %s1817_s11 = smov 0   ;;  %s1819_s12 = smov 0  }
   0x6   :  { %s1821_s13 = smov 0   ;;  %s1823_s14 = smov 0  }
   0x7 LB: > { %s1333_s15 = sadd.s32 4294967295, %s1789_s14   ;;  %s1334_s16 = sadd.s32 4294967294, %s1789_s14   ;;  %s1789_s14 = sphi %s1823_s14, %s19_s14   ;;  %s1785_s13 = sphi %s1821_s13, %s2163_s13   ;;  %s1781_s12 = sphi %s1819_s12, %s2162_s12   ;;  %s1777_s11 = sphi %s1817_s11, %s2161_s11   ;;  %s1773_s10 = sphi %s1815_s10, %s2160_s10   ;;  %s1769_s9 = sphi %s1813_s9, %s2159_s9  }
   0x8   : > { %p60_p0 = scmp.ne.s32.totalorder %s1773_s10, %s1769_s9  ;;  %p1847_p1 = scmp.eq.s32.totalorder %s1333_s15, 0 }
   0x9   : > { %p1851_p2 = scmp.eq.s32.totalorder %s1333_s15, 3  ;;  %p120_p3 = scmp.eq.s32.totalorder %s1334_s16, 3 }
   0xa   : > { %s2145_s17 = scalar_select %p1847_p1, 1, 0 }
   0xb   : > { %s2146_s18 = scalar_select %p1851_p2, 1, 0 }
   0xc   : > { %p1857_p4 = por %p1847_p1, %p60_p0  ;;  %p1335_p5 = scmp.ge.s32.totalorder %s1789_s14, 1 }
   0xd   : > { %p1862_p6 = por %p120_p3, %p60_p0  ;;  %p127_p7 = scmp.lt.s32.totalorder %s1789_s14, 5 }
   0xe   : > { %s2147_s19 = scalar_select %p1857_p4, 1, 0 }
   0xf   : > { %s2148_s20 = scalar_select %p1862_p6, 1, 0 }
  0x10   : > { %p1867_p8 = pnand %p1335_p5, %p127_p7  ;;  %s1791_s22 = smov [#allocation6]  }
  0x11   : > { %s143_s23 = sshll.u32 %s1791_s22, 4  ;;  %s38_s25 = sadd.s32 1, %s1785_s13  ;;  %s144_s23 = int_to_ptr.vmem [resolvable:$true] %s143_s23 }
  0x12   : > { %s2149_s21 = scalar_select %p1867_p8, 1, 0 }
  0x13   : > { %p1536_p9 = pneg %p1867_p8  ;;  %s1645_s28 = scalar_lea.hbm %s2139_s1, 1024 }
  0x14   : > { %p1646_p11 = scmp.ne.s32.totalorder %s2139_s1, %s1645_s28  ;;  %p1652_p3 = scmp.lt.u32.totalorder %s1645_s28, %s2139_s1 }
  0x15   : > { %p1875_p10 = pnand %p1536_p9, %p1847_p1 }
  0x17   : > { %p1647_p12 = pneg %p1875_p10 }
  0x19   : > { %p1648_p13 = pnand %p1647_p12, %p1646_p11 }
  0x1b   : > { %p1649_p0 = pneg %p1648_p13 }
  0x1d   : > { %p1654_p5 = pnand %p1652_p3, %p1649_p0 }
  0x1f   : > { %1657 = shalt.err (!%p1654_p5)
}
  0x20   : > { %s1658_s5 = scalar_lea.vmem %s144_s23, 1024  ;;  %p1666_p1 = scmp.lt.s32.totalorder %s144_s23, %s144_s23 }
  0x21   : > { %p1659_p7 = scmp.ne.s32.totalorder %s144_s23, %s1658_s5  ;;  %p1667_p4 = scmp.lt.s32.totalorder %s1658_s5, %s1658_s5 }
  0x23   : > { %p1661_p9 = pnand %p1659_p7, %p1647_p12  ;;  %p1668_p8 = por %p1667_p4, %p1666_p1 }
  0x25   : > { %p1662_p6 = pneg %p1661_p9 }
  0x27   : > { %p1669_p2 = pnand %p1668_p8, %p1662_p6 }
  0x29   : > { %1672 = shalt.err (!%p1669_p2)
}
  0x2a   : > { %s1792_s6 = smov 64   ;;  %s1793_s7 = smov 4  }
  0x2b   : > { %1539 = dma.hbm_to_vmem [thread:$0]  (!%p1875_p10), %s2139_s1, 1024, %s144_s23, [#allocation7], %s1792_s6, %s1792_s6, %s1793_s7  }
  0x2c   : > { %p40_p1 = scmp.ge.s32.totalorder %s38_s25, 4  ;;  %s47_s16 = sadd.s32 1, %s1777_s11 }
  0x2d   : > { %p54_p2 = scmp.ne.s32.totalorder %s1777_s11, %s1773_s10  ;;  %p55_p4 = scmp.eq.s32.totalorder %s1789_s14, 0 }
  0x2e   : > { %s2165_s25 = smov (%p40_p1, %s38_s25), 0  ;;  %p2152_p8 = scmp.ne.s32.totalorder %s2146_s18, 0 }
  0x2f   : > { %p1905_p6 = por %p55_p4, %p54_p2  ;;  %s42_s26 = ssub.s32 %s1785_s13, %s2165_s25 }
  0x30   : > { %p1911_p11 = por %p2152_p8, %p54_p2  ;;  %p1549_p12 = scmp.lt.s32.totalorder %s1789_s14, 4 }
  0x31   : > { %p45_p10 = scmp.eq.s32.totalorder %s42_s26, 0  ;;  %s157_s23 = sand.u32 1, %s1777_s11  }
  0x32   : > { %s1338_s27 = sshll.u32 %s157_s23, 8  ;;  %s1390_s29 = sshll.u32 %s1785_s13, 12 }
  0x33   : > { %s1920_s28 = scalar_select %p45_p10, %s1777_s11, %s47_s16  }
  0x34   : > { %s1926_s4 = scalar_lea.hbm %s2138_s0, %s1390_s29  ;;  %s161_s18 = scalar_lea.vmem [#allocation3], %s1338_s27 }
  0x35   : > { %s169_s5 = sshll.u32 %s161_s18, 4  ;;  %p1932_p13 = pnand %p1549_p12, %p1905_p6  ;;  %s1928_s5 = int_to_ptr.vmem [resolvable:$true] %s169_s5 }
  0x36   : > { %s1936_s15 = scalar_lea.sflag [#allocation4], %s157_s23  ;;  %s1673_s16 = scalar_lea.hbm %s1926_s4, 4096 }
  0x37   : > { %p1674_p0 = scmp.ne.s32.totalorder %s1926_s4, %s1673_s16  ;;  %p1675_p3 = pneg %p1932_p13 }
  0x38   : > { %s1678_s22 = scalar_lea.hbm %s2138_s0, 16384  ;;  %p1679_p9 = scmp.lt.u32.totalorder %s1926_s4, %s2138_s0 }
  0x39   : > { %p1676_p5 = pnand %p1675_p3, %p1674_p0  ;;  %p1680_p1 = scmp.lt.u32.totalorder %s1678_s22, %s1673_s16 }
  0x3a   : > { %p1682_p4 = scmp.lt.u32.totalorder %s1673_s16, %s1926_s4 }
  0x3b   : > { %p1677_p7 = pneg %p1676_p5  ;;  %p1681_p2 = por %p1680_p1, %p1679_p9 }
  0x3d   : > { %p1683_p6 = por %p1682_p4, %p1681_p2 }
  0x3f   : > { %p1684_p8 = pnand %p1683_p6, %p1677_p7 }
  0x41   : > { %1687 = shalt.err (!%p1684_p8)
}
  0x42   : > { %s1688_s23 = scalar_lea.vmem %s1928_s5, 4096  ;;  %s1794_s3 = smov [#allocation3]  }
  0x43   : > { %p1689_p12 = scmp.ne.s32.totalorder %s1928_s5, %s1688_s23  ;;  %s1693_s18 = sshll.u32 %s1794_s3, 4  ;;  %s1694_s18 = int_to_ptr.vmem [resolvable:$false] %s1693_s18 }
  0x44   : > { %s1695_s26 = scalar_lea.vmem %s1694_s18, 8192  ;;  %p1696_p5 = scmp.lt.s32.totalorder %s1928_s5, %s1694_s18 }
  0x45   : > { %p1691_p10 = pnand %p1689_p12, %p1675_p3  ;;  %p1697_p9 = scmp.lt.s32.totalorder %s1695_s26, %s1688_s23 }
  0x47   : > { %p1692_p0 = pneg %p1691_p10  ;;  %p1698_p1 = por %p1697_p9, %p1696_p5 }
  0x49   : > { %p1699_p2 = pnand %p1698_p1, %p1692_p0 }
  0x4b   : > { %1702 = shalt.err (!%p1699_p2)
}
  0x4c   : > { %1543 = dma.hbm_to_vmem [thread:$0]  (!%p1932_p13), %s1926_s4, 4096, %s1928_s5, %s1936_s15, %s1792_s6, %s1792_s6, %s1793_s7  }
  0x4d   : > { %p2155_p3 = scmp.ne.s32.totalorder %s2149_s21, 0 }
  0x4e   : > { %s1970_s16 = sand.u32 (!%p2155_p3), 1, %s1773_s10   ;;  %p2156_p7 = scmp.ne.s32.totalorder (!%p2155_p3), %s2147_s19, 0 }
  0x4f   : > { %181 = sbr.rel (%p2155_p3) target bundleno = 409 (0x199), region = 28  ;;  %s1342_s27 = sshll.u32 (!%p2155_p3), %s1970_s16, 8 }
  0x50   : > { %s184_s22 = scalar_lea.sflag (!%p2155_p3), [#allocation4], %s1970_s16  ;;  %s1974_s29 = scalar_lea.vmem (!%p2155_p3), [#allocation3], %s1342_s27 }
  0x56   : > { %1756 = dma.done.wait (%p2156_p7), %s184_s22, 4096  }
  0x57   : > { %1758 = vsyncadd (%p2156_p7), %s184_s22, 4294963200  ;;  %p2157_p13 = scmp.ne.s32.totalorder %s2145_s17, 0 }
  0x59   : > { %1760 = dma.done.wait (%p2157_p13), [#allocation7], 1024  }
  0x5a   : > { %1762 = vsyncadd (%p2157_p13), [#allocation7], 4294966272  ;;  %v1605_v0 = vld [vmem:[#allocation6] sm:$0xff]   ;;  %v1606_v1 = vld [vmem:[#allocation6 + $0x8] sm:$0xff]   ;;  %s1344_s17 = sshll.u32 %s1970_s16, 9  ;;  %s1391_s21 = sshll.u32 %s1781_s12, 13 }
  0x5b   : > { %1432 = vmatprep.subr.bf16.mxu0 %v1605_v0  ;;  %1512 = vmatprep.subr.bf16.mxu1 %v1605_v0  ;;  %v1607_v2 = vld [vmem:[#allocation6 + $0x10] sm:$0xff]   ;;  %v1608_v3 = vld [vmem:[#allocation6 + $0x18] sm:$0xff]   ;;  %v1613_v4 = vld [vmem:[%s1974_s29] sm:$0xff]   ;;  %s2017_s19 = scalar_lea.vmem [#allocation8], %s1344_s17  ;;  %s2082_s5 = scalar_lea.hbm %s2140_s2, %s1391_s21 }
  0x5c   : > { %1433 = vmatpush3.bf16.msra.mxu0 %v1605_v0  ;;  %1520 = vmatpush3.bf16.msra.mxu1 %v1605_v0  ;;  %v1614_v5 = vld [vmem:[%s1974_s29 + $0x80] sm:$0xff]   ;;  %v1610_v7 = vld [vmem:[#allocation6 + $0x28] sm:$0xff]   ;;  %v1611_v8 = vld [vmem:[#allocation6 + $0x30] sm:$0xff]   ;;  %s1231_s6 = sshll.u32 %s2017_s19, 4  ;;  %s1217_s12 = scalar_lea.sflag [#allocation5], %s1970_s16  ;;  %s2084_s6 = int_to_ptr.vmem [resolvable:$true] %s1231_s6 }
  0x5d   : > { %1434 = vmatprep.subr.bf16.mxu0 %v1606_v1  ;;  %1513 = vmatprep.subr.bf16.mxu1 %v1606_v1  ;;  %v1609_v6 = vld [vmem:[#allocation6 + $0x20] sm:$0xff]   ;;  %v1612_v9 = vld [vmem:[#allocation6 + $0x38] sm:$0xff]   ;;  %v1615_v10 = vld [vmem:[%s1974_s29 + $0x8] sm:$0xff]   ;;  %s1703_s8 = scalar_lea.vmem %s2084_s6, 8192  ;;  %s1795_s15 = smov [#allocation8]  }
  0x5e   : > { %1448 = vmatprep.mubr.bf16.mxu0 %v1613_v4  ;;  %1480 = vmatprep.mubr.bf16.mxu1 %v1614_v5  ;;  %v1616_v11 = vld [vmem:[%s1974_s29 + $0x88] sm:$0xff]   ;;  %v1617_v12 = vld [vmem:[%s1974_s29 + $0x10] sm:$0xff]   ;;  %v1619_v14 = vld [vmem:[%s1974_s29 + $0x18] sm:$0xff]   ;;  %p1704_p4 = scmp.ne.s32.totalorder %s2084_s6, %s1703_s8  ;;  %s1707_s30 = sshll.u32 %s1795_s15, 4  ;;  %s1708_s30 = int_to_ptr.vmem [resolvable:$false] %s1707_s30 }
  0x5f   : > { %v1618_v13 = vld [vmem:[%s1974_s29 + $0x90] sm:$0xff]   ;;  %v1620_v15 = vld [vmem:[%s1974_s29 + $0x98] sm:$0xff]   ;;  %v1621_v16 = vld [vmem:[%s1974_s29 + $0x20] sm:$0xff]   ;;  %s1709_s23 = scalar_lea.vmem %s1708_s30, 16384  ;;  %p1710_p12 = scmp.lt.s32.totalorder %s2084_s6, %s1708_s30 }
  0x60   : > { %1435 = vmatpush3.bf16.msra.mxu0 %v1606_v1  ;;  %1521 = vmatpush3.bf16.msra.mxu1 %v1606_v1  ;;  %v1622_v17 = vld [vmem:[%s1974_s29 + $0xa0] sm:$0xff]   ;;  %v1623_v18 = vld [vmem:[%s1974_s29 + $0x28] sm:$0xff]   ;;  %v1625_v20 = vld [vmem:[%s1974_s29 + $0x30] sm:$0xff]   ;;  %p1705_p6 = pnand %p1704_p4, %p1911_p11  ;;  %p1711_p10 = scmp.lt.s32.totalorder %s1709_s23, %s1703_s8 }
  0x61   : > { %1436 = vmatprep.subr.bf16.mxu0 %v1607_v2  ;;  %1514 = vmatprep.subr.bf16.mxu1 %v1607_v2  ;;  %v1624_v19 = vld [vmem:[%s1974_s29 + $0xa8] sm:$0xff]   ;;  %v1626_v21 = vld [vmem:[%s1974_s29 + $0xb0] sm:$0xff]   ;;  %v1627_v22 = vld [vmem:[%s1974_s29 + $0x38] sm:$0xff]  }
  0x62   : > { %v1628_v23 = vld [vmem:[%s1974_s29 + $0xb8] sm:$0xff]   ;;  %v1629_v24 = vld [vmem:[%s1974_s29 + $0x40] sm:$0xff]   ;;  %v1631_v26 = vld [vmem:[%s1974_s29 + $0x48] sm:$0xff]   ;;  %p1706_p8 = pneg %p1705_p6  ;;  %p1712_p0 = por %p1711_p10, %p1710_p12 }
  0x63   : > { %v1630_v25 = vld [vmem:[%s1974_s29 + $0xc0] sm:$0xff]   ;;  %v1632_v27 = vld [vmem:[%s1974_s29 + $0xc8] sm:$0xff]   ;;  %v1633_v28 = vld [vmem:[%s1974_s29 + $0x50] sm:$0xff]  }
  0x64   : > { %1437 = vmatpush3.bf16.msra.mxu0 %v1607_v2  ;;  %1522 = vmatpush3.bf16.msra.mxu1 %v1607_v2  ;;  %v1634_v29 = vld [vmem:[%s1974_s29 + $0xd0] sm:$0xff]   ;;  %v1635_v30 = vld [vmem:[%s1974_s29 + $0x58] sm:$0xff]   ;;  %v1637_v32 = vld [vmem:[%s1974_s29 + $0x60] sm:$0xff]   ;;  %p1713_p5 = pnand %p1712_p0, %p1706_p8 }
  0x65   : > { %1438 = vmatprep.subr.bf16.mxu0 %v1608_v3  ;;  %1515 = vmatprep.subr.bf16.mxu1 %v1608_v3  ;;  %v1636_v31 = vld [vmem:[%s1974_s29 + $0xd8] sm:$0xff]   ;;  %v1638_v33 = vld [vmem:[%s1974_s29 + $0xe0] sm:$0xff]   ;;  %v1639_v34 = vld [vmem:[%s1974_s29 + $0x68] sm:$0xff]  }
  0x66   : > { %v1640_v35 = vld [vmem:[%s1974_s29 + $0xe8] sm:$0xff]   ;;  %v1641_v36 = vld [vmem:[%s1974_s29 + $0x70] sm:$0xff]   ;;  %v1643_v38 = vld [vmem:[%s1974_s29 + $0x78] sm:$0xff]  }
  0x67   : > { %v1642_v37 = vld [vmem:[%s1974_s29 + $0xf0] sm:$0xff]   ;;  %v1644_v39 = vld [vmem:[%s1974_s29 + $0xf8] sm:$0xff]  }
  0x68   : > { %1439 = vmatpush3.bf16.msra.mxu0 %v1608_v3  ;;  %1523 = vmatpush3.bf16.msra.mxu1 %v1608_v3 }
  0x69   : > { %1440 = vmatprep.subr.bf16.mxu0 %v1609_v6  ;;  %1516 = vmatprep.subr.bf16.mxu1 %v1609_v6 }
  0x6c   : > { %1441 = vmatpush3.bf16.msra.mxu0 %v1609_v6  ;;  %1524 = vmatpush3.bf16.msra.mxu1 %v1609_v6 }
  0x6d   : > { %1442 = vmatprep.subr.bf16.mxu0 %v1610_v7  ;;  %1517 = vmatprep.subr.bf16.mxu1 %v1610_v7 }
  0x70   : > { %1443 = vmatpush3.bf16.msra.mxu0 %v1610_v7  ;;  %1525 = vmatpush3.bf16.msra.mxu1 %v1610_v7 }
  0x71   : > { %1444 = vmatprep.subr.bf16.mxu0 %v1611_v8  ;;  %1518 = vmatprep.subr.bf16.mxu1 %v1611_v8 }
  0x74   : > { %1445 = vmatpush3.bf16.msra.mxu0 %v1611_v8  ;;  %1526 = vmatpush3.bf16.msra.mxu1 %v1611_v8 }
  0x75   : > { %1446 = vmatprep.subr.bf16.mxu0 %v1612_v9  ;;  %1519 = vmatprep.subr.bf16.mxu1 %v1612_v9 }
  0x78   : > { %1447 = vmatpush3.bf16.msra.mxu0 %v1612_v9  ;;  %1527 = vmatpush3.bf16.msra.mxu1 %v1612_v9 }
  0x7b   : > { %1449 = vmatmul.mubr.bf16.vlgmr.msra.gmra.mrb[0].mxu0 %v1615_v10  ;;  %1481 = vmatmul.mubr.bf16.vlgmr.msra.gmra.mrb[0].mxu1 %v1616_v11 }
  0x7c   : > { %1452 = vmatprep.mubr.bf16.mxu0 %v1617_v12  ;;  %1484 = vmatprep.mubr.bf16.mxu1 %v1618_v13 }
  0x83   : > { %1453 = vmatmul.mubr.bf16.gmra.mrb[4].mxu0 %v1619_v14  ;;  %1485 = vmatmul.mubr.bf16.gmra.mrb[4].mxu1 %v1620_v15 }
  0x84   : > { %1456 = vmatprep.mubr.bf16.mxu0 %v1621_v16  ;;  %1488 = vmatprep.mubr.bf16.mxu1 %v1622_v17 }
  0x8b   : > { %1457 = vmatmul.mubr.bf16.gmra.mrb[8].mxu0 %v1623_v18  ;;  %1489 = vmatmul.mubr.bf16.gmra.mrb[8].mxu1 %v1624_v19 }
  0x8c   : > { %1460 = vmatprep.mubr.bf16.mxu0 %v1625_v20  ;;  %1492 = vmatprep.mubr.bf16.mxu1 %v1626_v21 }
  0x93   : > { %1461 = vmatmul.mubr.bf16.gmra.mrb[12].mxu0 %v1627_v22  ;;  %1493 = vmatmul.mubr.bf16.gmra.mrb[12].mxu1 %v1628_v23 }
  0x94   : > { %1464 = vmatprep.mubr.bf16.mxu0 %v1629_v24  ;;  %1496 = vmatprep.mubr.bf16.mxu1 %v1630_v25 }
  0x9b   : > { %1465 = vmatmul.mubr.bf16.gmra.mrb[16].mxu0 %v1631_v26  ;;  %1497 = vmatmul.mubr.bf16.gmra.mrb[16].mxu1 %v1632_v27 }
  0x9c   : > { %1468 = vmatprep.mubr.bf16.mxu0 %v1633_v28  ;;  %1500 = vmatprep.mubr.bf16.mxu1 %v1634_v29 }
  0xa3   : > { %1469 = vmatmul.mubr.bf16.gmra.mrb[20].mxu0 %v1635_v30  ;;  %1501 = vmatmul.mubr.bf16.gmra.mrb[20].mxu1 %v1636_v31 }
  0xa4   : > { %1472 = vmatprep.mubr.bf16.mxu0 %v1637_v32  ;;  %1504 = vmatprep.mubr.bf16.mxu1 %v1638_v33 }
  0xab   : > { %1473 = vmatmul.mubr.bf16.gmra.mrb[24].mxu0 %v1639_v34  ;;  %1505 = vmatmul.mubr.bf16.gmra.mrb[24].mxu1 %v1640_v35 }
  0xac   : > { %1476 = vmatprep.mubr.bf16.mxu0 %v1641_v36  ;;  %1508 = vmatprep.mubr.bf16.mxu1 %v1642_v37 }
  0xb3   : > { %1477 = vmatmul.mubr.bf16.gmra.mrb[28].mxu0 %v1643_v38  ;;  %1509 = vmatmul.mubr.bf16.gmra.mrb[28].mxu1 %v1644_v39 }
 0x14e   : > { %v1450_v40 = vpop.f32.mrb[0].mxu0  ;;  %v1482_v41 = vpop.f32.mrb[0].mxu1 }
 0x14f   : > { %1154 = vst [vmem:[%s2017_s19 + $0x10] sm:$0xff] %v1450_v40  ;;  %1186 = vst [vmem:[%s2017_s19 + $0x110] sm:$0xff] %v1482_v41  ;;  %v702_v42 = vpop.f32.mrb[1].mxu0  ;;  %v830_v43 = vpop.f32.mrb[1].mxu1 }
 0x150   : > { %1152 = vst [vmem:[%s2017_s19] sm:$0xff] %v702_v42  ;;  %1184 = vst [vmem:[%s2017_s19 + $0x100] sm:$0xff] %v830_v43  ;;  %v1451_v44 = vpop.f32.mrb[2].mxu0  ;;  %v1483_v45 = vpop.f32.mrb[2].mxu1 }
 0x151   : > { %1155 = vst [vmem:[%s2017_s19 + $0x18] sm:$0xff] %v1451_v44  ;;  %1187 = vst [vmem:[%s2017_s19 + $0x118] sm:$0xff] %v1483_v45  ;;  %v705_v46 = vpop.f32.mrb[3].mxu0  ;;  %v833_v47 = vpop.f32.mrb[3].mxu1 }
 0x152   : > { %1153 = vst [vmem:[%s2017_s19 + $0x8] sm:$0xff] %v705_v46  ;;  %1185 = vst [vmem:[%s2017_s19 + $0x108] sm:$0xff] %v833_v47 }
 0x156   : > { %v1454_v48 = vpop.f32.mrb[4].mxu0  ;;  %v1486_v49 = vpop.f32.mrb[4].mxu1 }
 0x157   : > { %1158 = vst [vmem:[%s2017_s19 + $0x30] sm:$0xff] %v1454_v48  ;;  %1190 = vst [vmem:[%s2017_s19 + $0x130] sm:$0xff] %v1486_v49  ;;  %v718_v50 = vpop.f32.mrb[5].mxu0  ;;  %v846_v51 = vpop.f32.mrb[5].mxu1 }
 0x158   : > { %1156 = vst [vmem:[%s2017_s19 + $0x20] sm:$0xff] %v718_v50  ;;  %1188 = vst [vmem:[%s2017_s19 + $0x120] sm:$0xff] %v846_v51  ;;  %v1455_v52 = vpop.f32.mrb[6].mxu0  ;;  %v1487_v53 = vpop.f32.mrb[6].mxu1 }
 0x159   : > { %1159 = vst [vmem:[%s2017_s19 + $0x38] sm:$0xff] %v1455_v52  ;;  %1191 = vst [vmem:[%s2017_s19 + $0x138] sm:$0xff] %v1487_v53  ;;  %v721_v54 = vpop.f32.mrb[7].mxu0  ;;  %v849_v55 = vpop.f32.mrb[7].mxu1 }
 0x15a   : > { %1157 = vst [vmem:[%s2017_s19 + $0x28] sm:$0xff] %v721_v54  ;;  %1189 = vst [vmem:[%s2017_s19 + $0x128] sm:$0xff] %v849_v55 }
 0x15e   : > { %v1458_v56 = vpop.f32.mrb[8].mxu0  ;;  %v1490_v57 = vpop.f32.mrb[8].mxu1 }
 0x15f   : > { %1162 = vst [vmem:[%s2017_s19 + $0x50] sm:$0xff] %v1458_v56  ;;  %1194 = vst [vmem:[%s2017_s19 + $0x150] sm:$0xff] %v1490_v57  ;;  %v734_v58 = vpop.f32.mrb[9].mxu0  ;;  %v862_v59 = vpop.f32.mrb[9].mxu1 }
 0x160   : > { %1160 = vst [vmem:[%s2017_s19 + $0x40] sm:$0xff] %v734_v58  ;;  %1192 = vst [vmem:[%s2017_s19 + $0x140] sm:$0xff] %v862_v59  ;;  %v1459_v60 = vpop.f32.mrb[10].mxu0  ;;  %v1491_v61 = vpop.f32.mrb[10].mxu1 }
 0x161   : > { %1163 = vst [vmem:[%s2017_s19 + $0x58] sm:$0xff] %v1459_v60  ;;  %1195 = vst [vmem:[%s2017_s19 + $0x158] sm:$0xff] %v1491_v61  ;;  %v737_v62 = vpop.f32.mrb[11].mxu0  ;;  %v865_v63 = vpop.f32.mrb[11].mxu1 }
 0x162   : > { %1161 = vst [vmem:[%s2017_s19 + $0x48] sm:$0xff] %v737_v62  ;;  %1193 = vst [vmem:[%s2017_s19 + $0x148] sm:$0xff] %v865_v63 }
 0x166   : > { %v1462_v0 = vpop.f32.mrb[12].mxu0  ;;  %v1494_v1 = vpop.f32.mrb[12].mxu1 }
 0x167   : > { %1166 = vst [vmem:[%s2017_s19 + $0x70] sm:$0xff] %v1462_v0  ;;  %1198 = vst [vmem:[%s2017_s19 + $0x170] sm:$0xff] %v1494_v1  ;;  %v750_v2 = vpop.f32.mrb[13].mxu0  ;;  %v878_v3 = vpop.f32.mrb[13].mxu1 }
 0x168   : > { %1164 = vst [vmem:[%s2017_s19 + $0x60] sm:$0xff] %v750_v2  ;;  %1196 = vst [vmem:[%s2017_s19 + $0x160] sm:$0xff] %v878_v3  ;;  %v1463_v4 = vpop.f32.mrb[14].mxu0  ;;  %v1495_v5 = vpop.f32.mrb[14].mxu1 }
 0x169   : > { %1167 = vst [vmem:[%s2017_s19 + $0x78] sm:$0xff] %v1463_v4  ;;  %1199 = vst [vmem:[%s2017_s19 + $0x178] sm:$0xff] %v1495_v5  ;;  %v753_v6 = vpop.f32.mrb[15].mxu0  ;;  %v881_v7 = vpop.f32.mrb[15].mxu1 }
 0x16a   : > { %1165 = vst [vmem:[%s2017_s19 + $0x68] sm:$0xff] %v753_v6  ;;  %1197 = vst [vmem:[%s2017_s19 + $0x168] sm:$0xff] %v881_v7 }
 0x16e   : > { %v1466_v8 = vpop.f32.mrb[16].mxu0  ;;  %v1498_v9 = vpop.f32.mrb[16].mxu1 }
 0x16f   : > { %1170 = vst [vmem:[%s2017_s19 + $0x90] sm:$0xff] %v1466_v8  ;;  %1202 = vst [vmem:[%s2017_s19 + $0x190] sm:$0xff] %v1498_v9  ;;  %v766_v10 = vpop.f32.mrb[17].mxu0  ;;  %v894_v11 = vpop.f32.mrb[17].mxu1 }
 0x170   : > { %1168 = vst [vmem:[%s2017_s19 + $0x80] sm:$0xff] %v766_v10  ;;  %1200 = vst [vmem:[%s2017_s19 + $0x180] sm:$0xff] %v894_v11  ;;  %v1467_v12 = vpop.f32.mrb[18].mxu0  ;;  %v1499_v13 = vpop.f32.mrb[18].mxu1 }
 0x171   : > { %1171 = vst [vmem:[%s2017_s19 + $0x98] sm:$0xff] %v1467_v12  ;;  %1203 = vst [vmem:[%s2017_s19 + $0x198] sm:$0xff] %v1499_v13  ;;  %v769_v14 = vpop.f32.mrb[19].mxu0  ;;  %v897_v15 = vpop.f32.mrb[19].mxu1 }
 0x172   : > { %1169 = vst [vmem:[%s2017_s19 + $0x88] sm:$0xff] %v769_v14  ;;  %1201 = vst [vmem:[%s2017_s19 + $0x188] sm:$0xff] %v897_v15 }
 0x176   : > { %v1470_v16 = vpop.f32.mrb[20].mxu0  ;;  %v1502_v17 = vpop.f32.mrb[20].mxu1 }
 0x177   : > { %1174 = vst [vmem:[%s2017_s19 + $0xb0] sm:$0xff] %v1470_v16  ;;  %1206 = vst [vmem:[%s2017_s19 + $0x1b0] sm:$0xff] %v1502_v17  ;;  %v782_v18 = vpop.f32.mrb[21].mxu0  ;;  %v910_v19 = vpop.f32.mrb[21].mxu1 }
 0x178   : > { %1172 = vst [vmem:[%s2017_s19 + $0xa0] sm:$0xff] %v782_v18  ;;  %1204 = vst [vmem:[%s2017_s19 + $0x1a0] sm:$0xff] %v910_v19  ;;  %v1471_v20 = vpop.f32.mrb[22].mxu0  ;;  %v1503_v21 = vpop.f32.mrb[22].mxu1 }
 0x179   : > { %1175 = vst [vmem:[%s2017_s19 + $0xb8] sm:$0xff] %v1471_v20  ;;  %1207 = vst [vmem:[%s2017_s19 + $0x1b8] sm:$0xff] %v1503_v21  ;;  %v785_v22 = vpop.f32.mrb[23].mxu0  ;;  %v913_v23 = vpop.f32.mrb[23].mxu1 }
 0x17a   : > { %1173 = vst [vmem:[%s2017_s19 + $0xa8] sm:$0xff] %v785_v22  ;;  %1205 = vst [vmem:[%s2017_s19 + $0x1a8] sm:$0xff] %v913_v23 }
 0x17e   : > { %v1474_v24 = vpop.f32.mrb[24].mxu0  ;;  %v1506_v25 = vpop.f32.mrb[24].mxu1 }
 0x17f   : > { %1178 = vst [vmem:[%s2017_s19 + $0xd0] sm:$0xff] %v1474_v24  ;;  %1210 = vst [vmem:[%s2017_s19 + $0x1d0] sm:$0xff] %v1506_v25  ;;  %v798_v26 = vpop.f32.mrb[25].mxu0  ;;  %v926_v27 = vpop.f32.mrb[25].mxu1 }
 0x180   : > { %1176 = vst [vmem:[%s2017_s19 + $0xc0] sm:$0xff] %v798_v26  ;;  %1208 = vst [vmem:[%s2017_s19 + $0x1c0] sm:$0xff] %v926_v27  ;;  %v1475_v28 = vpop.f32.mrb[26].mxu0  ;;  %v1507_v29 = vpop.f32.mrb[26].mxu1 }
 0x181   : > { %1179 = vst [vmem:[%s2017_s19 + $0xd8] sm:$0xff] %v1475_v28  ;;  %1211 = vst [vmem:[%s2017_s19 + $0x1d8] sm:$0xff] %v1507_v29  ;;  %v801_v30 = vpop.f32.mrb[27].mxu0  ;;  %v929_v31 = vpop.f32.mrb[27].mxu1 }
 0x182   : > { %1177 = vst [vmem:[%s2017_s19 + $0xc8] sm:$0xff] %v801_v30  ;;  %1209 = vst [vmem:[%s2017_s19 + $0x1c8] sm:$0xff] %v929_v31 }
 0x186   : > { %v1478_v32 = vpop.f32.mrb[28].mxu0  ;;  %v1510_v33 = vpop.f32.mrb[28].mxu1 }
 0x187   : > { %1182 = vst [vmem:[%s2017_s19 + $0xf0] sm:$0xff] %v1478_v32  ;;  %1214 = vst [vmem:[%s2017_s19 + $0x1f0] sm:$0xff] %v1510_v33  ;;  %v814_v34 = vpop.f32.mrb[29].mxu0  ;;  %v942_v35 = vpop.f32.mrb[29].mxu1 }
 0x188   : > { %1180 = vst [vmem:[%s2017_s19 + $0xe0] sm:$0xff] %v814_v34  ;;  %1212 = vst [vmem:[%s2017_s19 + $0x1e0] sm:$0xff] %v942_v35  ;;  %v1479_v36 = vpop.f32.mrb[30].mxu0  ;;  %v1511_v37 = vpop.f32.mrb[30].mxu1 }
 0x189   : > { %1183 = vst [vmem:[%s2017_s19 + $0xf8] sm:$0xff] %v1479_v36  ;;  %1215 = vst [vmem:[%s2017_s19 + $0x1f8] sm:$0xff] %v1511_v37  ;;  %v817_v38 = vpop.f32.mrb[31].mxu0  ;;  %v945_v39 = vpop.f32.mrb[31].mxu1 }
 0x18a   : > { %1181 = vst [vmem:[%s2017_s19 + $0xe8] sm:$0xff] %v817_v38  ;;  %1213 = vst [vmem:[%s2017_s19 + $0x1e8] sm:$0xff] %v945_v39 }
 0x18b   : > { %1716 = shalt.err (!%p1713_p5)
}
 0x18c   : > { %s1717_s3 = scalar_lea.hbm %s2082_s5, 8192  ;;  %s1721_s27 = scalar_lea.hbm %s2140_s2, 32768 }
 0x18d   : > { %p1718_p9 = scmp.ne.s32.totalorder %s2082_s5, %s1717_s3  ;;  %p1722_p3 = scmp.lt.u32.totalorder %s2082_s5, %s2140_s2 }
 0x18e   : > { %p1723_p7 = scmp.lt.u32.totalorder %s1721_s27, %s1717_s3  ;;  %p1725_p4 = scmp.lt.u32.totalorder %s1717_s3, %s2082_s5 }
 0x18f   : > { %p1719_p1 = pnand %p1718_p9, %p1911_p11 }
 0x190   : > { %p1724_p13 = por %p1723_p7, %p1722_p3 }
 0x191   : > { %p1720_p2 = pneg %p1719_p1 }
 0x192   : > { %p1726_p6 = por %p1725_p4, %p1724_p13 }
 0x194   : > { %p1727_p8 = pnand %p1726_p6, %p1720_p2 }
 0x196   : > { %1730 = shalt.err (!%p1727_p8)
}
 0x197   : > { %s1796_s17 = smov 128   ;;  %s1797_s19 = smov 8  }
 0x198   : > { %1534 = dma.vmem_to_hbm [thread:$0]  (%p1911_p11), %s2084_s6, 8192, %s2082_s5, %s1217_s12, %s1796_s17, %s1796_s17, %s1797_s19  }
 0x199 PF: > { %p1551_p12 = scmp.ge.s32.totalorder %s1789_s14, 2  ;;  %s1246_s21 = sand.u32 1, %s1769_s9  }
 0x19a   : > { %p2158_p10 = scmp.ne.s32.totalorder %s2148_s20, 0  ;;  %s1247_s7 = scalar_lea.sflag [#allocation5], %s1246_s21 }
 0x19c   : > { %p1545_p0 = pnand %p1551_p12, %p2158_p10 }
 0x19e   : > { %1764 = dma.done.wait (!%p1545_p0), %s1247_s7, 8192  }
 0x19f   : > { %1766 = vsyncadd (!%p1545_p0), %s1247_s7, 4294959104  ;;  %s19_s14 = sadd.s32 1, %s1789_s14   ;;  %s2159_s9 = smov %s1773_s10 }
 0x1a0   : > { %p16_p5 = scmp.ge.s32.totalorder %s19_s14, 6   ;;  %s2160_s10 = smov %s1777_s11 }
 0x1a1   : > { %s2161_s11 = smov %s1920_s28  ;;  %s2162_s12 = smov %s1785_s13 }
 0x1a2   : > { %s2163_s13 = smov %s2165_s25  ;;  %18 = sbr.rel (!%p16_p5) target bundleno = 7 (0x7), region = 86 }
 0x1a9   :  { %1252 = vsyncpa [#allocation4], 1 }
 0x1aa   :  { %1254 = vsyncpa [#allocation4 + $0x1], 1 }
 0x1ab   :  { %1255 = vsyncpa [#allocation7], 1 }
 0x1ac   :  { %1256 = vsyncpa [#allocation5], 1 }
 0x1ad   :  { %1258 = vsyncpa [#allocation5 + $0x1], 1 }

</bundles_post_ra>
